<compile_context>
chip_gen: v7x
topology: tpu7x:2x2x1
jax: 0.10.0
libtpu: 0.0.40
codegen_flags: <defaults>
</compile_context>

<pallas_src>
import jax
import jax.numpy as jnp
import numpy as np
from jax.experimental import pallas as pl
from jax.experimental.pallas import tpu as pltpu


def _density_dynamics_kernel(x_ref, w1_ref, b1_ref, w2s_ref, b2s_ref, out_ref):
    # x:   [TB, D]        (f32 or bf16)
    # w1:  [D, H]         (f32 or bf16)
    # b1:  [1, H]         f32, time conditioning already folded in
    # w2s: [2H, D+1]      stacked [[W2, 0], [0, dd]]  (f32 or bf16)
    # b2s: [1, D+1]       f32, = [b2, -sum(dd)]
    # out: [TB, D+1]      f32, = [dx/dt, dlogp/dt]
    pre = jnp.dot(x_ref[...], w1_ref[...],
                  preferred_element_type=jnp.float32)          # MXU, f32 acc
    a = jnp.tanh(pre + b1_ref[...])                            # VPU + EUP, f32

    # Stack [a, a*a] along K: column D of the matmul becomes sum_h a_h^2*dd_h;
    # adding the bias's last entry (-sum(dd)) turns it into -div.  No XLU
    # reduction, no select -- one dense store.
    a_stack = jnp.concatenate([a, a * a], axis=-1).astype(w2s_ref.dtype)
    out = jnp.dot(a_stack, w2s_ref[...],
                  preferred_element_type=jnp.float32) + b2s_ref[...]
    out_ref[...] = out.astype(out_ref.dtype)


def prepare_density_dynamics_params(w1, b1, wt, w2, b2, *,
                                     mxu_dtype=jnp.float32):
    """t-independent preprocessing, hoisted out of the per-ODE-step call."""
    f32 = jnp.float32
    w1 = jnp.asarray(w1, f32)
    w2 = jnp.asarray(w2, f32)
    D, H = w1.shape

    # Exact Jacobian-trace weights: dd_h = sum_i W1[i, h] * W2[h, i]
    dd = jnp.sum(w1.T * w2, axis=-1)                            # [H]

    # Stacked second-layer weight: rows 0..H-1 multiply a (-> dx columns),
    # rows H..2H-1 multiply a*a (-> divergence column D).
    w2s = jnp.zeros((2 * H, D + 1), f32)
    w2s = w2s.at[:H, :D].set(w2)
    w2s = w2s.at[H:, D].set(dd)

    # Padded bias; last entry -sum(dd) completes -div = (a*a)@dd - sum(dd).
    b2s = jnp.concatenate([jnp.asarray(b2, f32),
                           (-jnp.sum(dd)).reshape(1)]).reshape(1, D + 1)

    return dict(w1=w1.astype(mxu_dtype),
                w2s=w2s.astype(mxu_dtype),
                b1=jnp.asarray(b1, f32),
                wt=jnp.asarray(wt, f32),
                b2s=b2s,
                mxu_dtype=mxu_dtype)


def density_dynamics(t, x, params, *, block_b=4096):
    """t: scalar; x: [B, D]. Returns dstate [B, D+1] (last col = dlogp/dt)."""
    f32 = jnp.float32
    B, D = x.shape
    H = params["b1"].shape[0]
    out_cols = D + 1
    mxu_dtype = params["mxu_dtype"]

    x = x.astype(mxu_dtype)
    # Fold time conditioning into the first-layer bias (tiny [H] op per call).
    b1_eff = (params["b1"] + jnp.asarray(t, f32) * params["wt"]).reshape(1, H)

    # Batch tiling: kernel is HBM/overhead-bound, so use the biggest tile that
    # still leaves >= 2 grid steps (v7x megacore sharding; no-op on v5e/v6e).
    # A 4096-row f32 x-tile + out-tile is < 3 MiB double-buffered.
    def round_up(n, m):
        return ((n + m - 1) // m) * m
    tb = min(block_b, round_up(pl.cdiv(B, 2), 8))
    grid = (pl.cdiv(B, tb),)
    # NOTE: if B % tb != 0, padded rows of the last tile compute on stale VMEM
    # contents; harmless here (no cross-row coupling, padded rows never written
    # back), but do not add cross-row reductions without revisiting this.

    in_bytes = jnp.dtype(mxu_dtype).itemsize
    flops = 2 * B * D * H + 2 * B * (2 * H) * out_cols + 4 * B * H
    bytes_accessed = (in_bytes * (B * D + D * H + 2 * H * out_cols)
                      + 4 * (B * out_cols + H + out_cols))
    cost = pl.CostEstimate(flops=flops, transcendentals=B * H,
                           bytes_accessed=bytes_accessed)

    return pl.pallas_call(
        _density_dynamics_kernel,
        out_shape=jax.ShapeDtypeStruct((B, out_cols), f32),
        grid=grid,
        in_specs=[
            pl.BlockSpec((tb, D), lambda i: (i, 0)),            # x: batch-tiled
            pl.BlockSpec((D, H), lambda i: (0, 0)),             # W1: resident
            pl.BlockSpec((1, H), lambda i: (0, 0)),             # b1 + t*wt: resident
            pl.BlockSpec((2 * H, out_cols), lambda i: (0, 0)),  # stacked W2/dd: resident
            pl.BlockSpec((1, out_cols), lambda i: (0, 0)),      # [b2, -sum(dd)]: resident
        ],
        out_specs=pl.BlockSpec((tb, out_cols), lambda i: (i, 0)),
        compiler_params=pltpu.CompilerParams(
            dimension_semantics=("parallel",)),
        cost_estimate=cost,
    )(x, params["w1"], b1_eff, params["w2s"], params["b2s"])


def _reference(t, x, w1, b1, wt, w2, b2):
    pre = x @ w1 + b1[None, :] + t * wt[None, :]
    a = jnp.tanh(pre)
    dx = a @ w2 + b2[None, :]
    dd = jnp.sum(w1.T * w2, axis=-1)
    div = jnp.sum((1.0 - a * a) * dd[None, :], axis=-1, keepdims=True)
    return jnp.concatenate([dx, -div], axis=-1)


if __name__ == "__main__":
    B, D, H = 64, 16, 32

    key = jax.random.PRNGKey(0)
    kx, k1, kb1, kwt, k2, kb2 = jax.random.split(key, 6)

    # state = (x, logp); logp enters only as the discarded last element.
    x = jax.random.normal(kx, (B, D), dtype=jnp.float32)
    t = 0.5

    w1 = jax.random.normal(k1, (D, H), dtype=jnp.float32) / np.sqrt(D)
    b1 = jax.random.normal(kb1, (H,), dtype=jnp.float32) * 0.1
    wt = jax.random.normal(kwt, (H,), dtype=jnp.float32) * 0.1
    w2 = jax.random.normal(k2, (H, D), dtype=jnp.float32) / np.sqrt(H)
    b2 = jax.random.normal(kb2, (D,), dtype=jnp.float32) * 0.1

    ref = _reference(jnp.float32(t), x, w1, b1, wt, w2, b2)

    # f32 MXU-input path (exact).
    params = prepare_density_dynamics_params(w1, b1, wt, w2, b2)
    dstate = jax.block_until_ready(density_dynamics(t, x, params))
    np.testing.assert_allclose(np.asarray(dstate), np.asarray(ref),
                               rtol=1e-5, atol=2e-5)

    # bf16 MXU-input path (v6e/v7x bandwidth optimization; f32 accumulation,
    # bias/tanh/divergence math stay f32).
    params_bf16 = prepare_density_dynamics_params(w1, b1, wt, w2, b2,
                                                  mxu_dtype=jnp.bfloat16)
    dstate_bf16 = jax.block_until_ready(density_dynamics(t, x, params_bf16))
    np.testing.assert_allclose(np.asarray(dstate_bf16), np.asarray(ref),
                               rtol=5e-2, atol=5e-2)

    print("KERNEL_OK")
</pallas_src>

<mosaic_0001>
module attributes {stable_mosaic.version = 11 : i64} {
  func.func @_density_dynamics_kernel(%arg0: i32, %arg1: memref<32x16xf32, #tpu.memory_space<vmem>>, %arg2: memref<16x32xf32, #tpu.memory_space<vmem>>, %arg3: memref<1x32xf32, #tpu.memory_space<vmem>>, %arg4: memref<64x17xf32, #tpu.memory_space<vmem>>, %arg5: memref<1x17xf32, #tpu.memory_space<vmem>>, %arg6: memref<32x17xf32, #tpu.memory_space<vmem>>) attributes {dimension_semantics = [#tpu.dimension_semantics<parallel>], iteration_bounds = array<i64: 2>, scalar_prefetch = 0 : i64, scratch_operands = 0 : i64, tpu.core_type = #tpu.core_type<tc>, window_params = [{transform_indices = @transform_0, window_bounds = array<i64: 32, 16>}, {pipeline_mode = #tpu.pipeline_mode<synchronous>, transform_indices = @transform_1, window_bounds = array<i64: 16, 32>}, {pipeline_mode = #tpu.pipeline_mode<synchronous>, transform_indices = @transform_2, window_bounds = array<i64: 1, 32>}, {pipeline_mode = #tpu.pipeline_mode<synchronous>, transform_indices = @transform_3, window_bounds = array<i64: 64, 17>}, {pipeline_mode = #tpu.pipeline_mode<synchronous>, transform_indices = @transform_4, window_bounds = array<i64: 1, 17>}, {transform_indices = @transform_5, window_bounds = array<i64: 32, 17>}]} {
    %c0 = arith.constant 0 : index
    %c0_0 = arith.constant 0 : index
    %0 = vector.load %arg1[%c0, %c0_0] : memref<32x16xf32, #tpu.memory_space<vmem>>, vector<32x16xf32>
    %c0_1 = arith.constant 0 : index
    %c0_2 = arith.constant 0 : index
    %1 = vector.load %arg2[%c0_1, %c0_2] : memref<16x32xf32, #tpu.memory_space<vmem>>, vector<16x32xf32>
    %cst = arith.constant dense<0.000000e+00> : vector<32x32xf32>
    %2 = tpu.matmul %0, %1, %cst {dimension_numbers = #tpu.dot_dimension_numbers<[1], [0], [0], [1], [0, 0, 1, 1], [], []>} : vector<32x16xf32>, vector<16x32xf32>, vector<32x32xf32> -> vector<32x32xf32>
    %c0_3 = arith.constant 0 : index
    %c0_4 = arith.constant 0 : index
    %3 = vector.load %arg3[%c0_3, %c0_4] : memref<1x32xf32, #tpu.memory_space<vmem>>, vector<1x32xf32>
    %4 = vector.broadcast %3 : vector<1x32xf32> to vector<32x32xf32>
    %5 = arith.addf %2, %4 : vector<32x32xf32>
    %6 = math.tanh %5 : vector<32x32xf32>
    %7 = arith.mulf %6, %6 : vector<32x32xf32>
    %8 = tpu.concatenate %6, %7 in 1 : vector<32x32xf32>, vector<32x32xf32> -> vector<32x64xf32>
    %c0_5 = arith.constant 0 : index
    %c0_6 = arith.constant 0 : index
    %9 = vector.load %arg4[%c0_5, %c0_6] : memref<64x17xf32, #tpu.memory_space<vmem>>, vector<64x17xf32>
    %cst_7 = arith.constant dense<0.000000e+00> : vector<32x17xf32>
    %10 = tpu.matmul %8, %9, %cst_7 {dimension_numbers = #tpu.dot_dimension_numbers<[1], [0], [0], [1], [0, 0, 1, 1], [], []>} : vector<32x64xf32>, vector<64x17xf32>, vector<32x17xf32> -> vector<32x17xf32>
    %c0_8 = arith.constant 0 : index
    %c0_9 = arith.constant 0 : index
    %11 = vector.load %arg5[%c0_8, %c0_9] : memref<1x17xf32, #tpu.memory_space<vmem>>, vector<1x17xf32>
    %12 = vector.broadcast %11 : vector<1x17xf32> to vector<32x17xf32>
    %13 = arith.addf %10, %12 : vector<32x17xf32>
    %c0_10 = arith.constant 0 : index
    %c0_11 = arith.constant 0 : index
    %14 = vector.load %arg6[%c0_10, %c0_11] : memref<32x17xf32, #tpu.memory_space<vmem>>, vector<32x17xf32>
    tpu.vector_store %arg6[%c0_10, %c0_11], %13 {strides = array<i32>} : memref<32x17xf32, #tpu.memory_space<vmem>>, vector<32x17xf32>,
    return
  }
  func.func @transform_0(%arg0: i32) -> (i32, i32) {
    %c0_i32 = arith.constant 0 : i32
    %c0_i32_0 = arith.constant 0 : i32
    return %arg0, %c0_i32 : i32, i32
  }
  func.func @transform_1(%arg0: i32) -> (i32, i32) {
    %c0_i32 = arith.constant 0 : i32
    %c0_i32_0 = arith.constant 0 : i32
    %c0_i32_1 = arith.constant 0 : i32
    return %c0_i32, %c0_i32_0 : i32, i32
  }
  func.func @transform_2(%arg0: i32) -> (i32, i32) {
    %c0_i32 = arith.constant 0 : i32
    %c0_i32_0 = arith.constant 0 : i32
    %c0_i32_1 = arith.constant 0 : i32
    return %c0_i32, %c0_i32_0 : i32, i32
  }
  func.func @transform_3(%arg0: i32) -> (i32, i32) {
    %c0_i32 = arith.constant 0 : i32
    %c0_i32_0 = arith.constant 0 : i32
    %c0_i32_1 = arith.constant 0 : i32
    return %c0_i32, %c0_i32_0 : i32, i32
  }
  func.func @transform_4(%arg0: i32) -> (i32, i32) {
    %c0_i32 = arith.constant 0 : i32
    %c0_i32_0 = arith.constant 0 : i32
    %c0_i32_1 = arith.constant 0 : i32
    return %c0_i32, %c0_i32_0 : i32, i32
  }
  func.func @transform_5(%arg0: i32) -> (i32, i32) {
    %c0_i32 = arith.constant 0 : i32
    %c0_i32_0 = arith.constant 0 : i32
    return %arg0, %c0_i32 : i32, i32
  }
}

</mosaic_0001>

<bundles_post_ra>
// kernel: tpu_custom_call.1
= control target key start
LH: loop header
LB: loop body
LE: loop exit
PB: predicated region body
PF: predicated region fallthrough
CT: control target
= control target key end

     0   :  { %s689_s18 = smov 0   ;;  %s749_s0 = inlined_call_operand.vmem [shape: f32[64,16], index: 0, kind: input, shape index: {}]   ;;  %s750_s1 = inlined_call_operand.vmem [shape: f32[16,32], index: 1, kind: input, shape index: {}]   ;;  %s751_s2 = inlined_call_operand.vmem [shape: f32[1,32], index: 2, kind: input, shape index: {}]   ;;  %s752_s3 = inlined_call_operand.vmem [shape: f32[64,17], index: 3, kind: input, shape index: {}]   ;;  %s753_s4 = inlined_call_operand.vmem [shape: f32[1,17], index: 4, kind: input, shape index: {}]   ;;  %s754_s5 = inlined_call_operand.vmem [shape: f32[64,17], index: 5, kind: output, shape index: {}]  }
   0x1 LB: > { %s542_s19 = sadd.s32 4294967295, %s656_s18   ;;  %p546_p0 = scmp.ge.s32.totalorder %s656_s18, 1  ;;  %s656_s18 = sphi %s689_s18, %s15_s18  }
   0x2   : > { %p188_p1 = scmp.lt.s32.totalorder %s656_s18, 3 }
   0x4   : > { %p189_p2 = pnand %p546_p0, %p188_p1 }
   0x5   : > { %v232_v0 = vld [vmem:[%s750_s1] sm:$0xff] (!%p189_p2)  ;;  %v233_v1 = vld [vmem:[%s750_s1 + $0x8] sm:$0xff] (!%p189_p2)  ;;  %s547_s24 = sshll.u32 (!%p189_p2), %s542_s19, 2  ;;  %vm241_vm0 = vcmask (!%p189_p2), 130048   ;;  %v370_v9 = vld [vmem:[%s752_s3 + $0x10] sm:$0xff] (!%p189_p2)  ;;  %s658_s23 = smov (!%p189_p2), 32  }
   0x6   : > { %192 = sbr.rel (%p189_p2) target bundleno = 586 (0x24a), region = 40  ;;  %v613_v2 = vpack.c.bf16 (!%p189_p2), %v233_v1, %v232_v0  ;;  %p217_p3 = scmp.lt.s32.totalorder (!%p189_p2), %s547_s24, 7  ;;  %v368_v7 = vld [vmem:[%s752_s3] sm:$0xff] (!%p189_p2)  ;;  %v369_v8 = vld [vmem:[%s752_s3 + $0x8] sm:$0xff] (!%p189_p2)  ;;  %v371_v11 = vld [vmem:[%s752_s3 + $0x18] sm:$0xff] (!%p189_p2)  ;;  %vm363_vm1 = vcmask (!%p189_p2), 261120  }
   0x7   : > { %v617_v10 = vpack.c.bf16 (!%p189_p2), %v369_v8, %v368_v7  ;;  %v621_v12 = vpack.c.bf16 (!%p189_p2), %v371_v11, %v370_v9  ;;  %v372_v13 = vld [vmem:[%s752_s3 + $0x20] sm:$0xff] (!%p189_p2)  ;;  %v373_v14 = vld [vmem:[%s752_s3 + $0x28] sm:$0xff] (!%p189_p2)  ;;  %v374_v21 = vld [vmem:[%s752_s3 + $0x30] sm:$0xff] (!%p189_p2)  ;;  %vm383_vm2 = vcmask (!%p189_p2), 523264   ;;  %vm481_vm3 = vcmask (!%p189_p2), 138240  }
   0x8   : > { %614 = vmatprep.subr.bf16.mxu0 (!%p189_p2), %v613_v2  ;;  %v625_v15 = vpack.c.bf16 (!%p189_p2), %v373_v14, %v372_v13  ;;  %v551_v16 = vld [vmem:[%s751_s2] ss:$0 sm:$0xff] (!%p189_p2)  ;;  %v375_v22 = vld [vmem:[%s752_s3 + $0x38] sm:$0xff] (!%p189_p2) }
   0x9   : > { %616 = vmatpush3.bf16.msra.mxu0 (!%p189_p2), %v613_v2  ;;  %618 = vmatprep.subr.bf16.mxu1 (!%p189_p2), %v617_v10  ;;  %v629_v23 = vpack.c.bf16 (!%p189_p2), %v375_v22, %v374_v21  ;;  %v556_v44 = vld [vmem:[%s753_s4] ss:$0 sm:$0xff] (!%p189_p2) }
   0xa   : > { %620 = vmatpush3.bf16.msra.mxu1 (!%p189_p2), %v617_v10 }
   0xb   : > { %622 = vmatprep.subr.bf16.mxu1 (!%p189_p2), %v621_v12 }
   0xd   : > { %s756_s24 = smov (!%p217_p3, %s547_s24), 7 }
   0xe   : > { %s548_s25 = sshll.u32 %s756_s24, 3  ;;  %624 = vmatpush3.bf16.msra.mxu1 %v621_v12 }
   0xf   : > { %s220_s28 = scalar_lea.vmem %s749_s0, %s548_s25  ;;  %626 = vmatprep.subr.bf16.mxu1 %v625_v15  ;;  %s226_s30 = scalar_lea.vmem %s754_s5, %s548_s25 }
  0x10   : > { %v228_v3 = vld [vmem:[%s220_s28] sm:$0xff]  ;;  %v229_v4 = vld [vmem:[%s220_s28 + $0x8] sm:$0xff]  ;;  %v230_v5 = vld [vmem:[%s220_s28 + $0x10] sm:$0xff] }
  0x11   : > { %585 = vmatprep.mubr.msk.f32.mxu0 %vm241_vm0, %v228_v3  ;;  %v231_v6 = vld [vmem:[%s220_s28 + $0x18] sm:$0xff] }
  0x12   : > { %586 = vmatmul.mubr.msk.f32.vlgmr.msra.gmra.mrb[0].mxu0 %vm241_vm0, %v229_v4  ;;  %628 = vmatpush3.bf16.msra.mxu1 %v625_v15 }
  0x13   : > { %588 = vmatprep.mubr.msk.f32.mxu0 %vm241_vm0, %v230_v5  ;;  %630 = vmatprep.subr.bf16.mxu1 %v629_v23 }
  0x16   : > { %589 = vmatmul.mubr.msk.f32.gmra.mrb[2].mxu0 %vm241_vm0, %v231_v6  ;;  %632 = vmatpush3.bf16.msra.mxu1 %v629_v23 }
  0xe5   : > { %v587_v17 = vpop.f32.mrb[0].mxu0 }
  0xe6   : > { %v320_v18 = vpop.f32.mrb[1].mxu0  ;;  %v326_v19 = vadd.f32 %v587_v17, %v551_v16 }
  0xe7   : > { %v321_v20 = vadd.f32 %v551_v16, %v320_v18 }
  0xe9   : > { %642 = vtanh.f32 %v321_v20  ;;  %v590_v24 = vpop.f32.mrb[2].mxu0 }
  0xea   : > { %v330_v25 = vpop.f32.mrb[3].mxu0  ;;  %644 = vtanh.f32 %v326_v19  ;;  %v336_v26 = vadd.f32 %v590_v24, %v551_v16 }
  0xeb   : > { %v331_v27 = vadd.f32 %v551_v16, %v330_v25 }
  0xed   : > { %646 = vtanh.f32 %v331_v27 }
  0xee   : > { %648 = vtanh.f32 %v336_v26 }
  0xf3   : > { %v643_v28 = vpop.eup %642 }
  0xf4   : > { %v343_v29 = vmul.f32 %v643_v28, %v643_v28  ;;  %v645_v30 = vpop.eup %644 }
  0xf5   : > { %v344_v33 = vmul.f32 %v645_v30, %v645_v30 }
  0xf6   : > { %351 = vrot.lane.b32.xlu0 %v343_v29, %s658_s23 }
  0xf7   : > { %v647_v31 = vpop.eup %646 }
  0xf8   : > { %v345_v32 = vmul.f32 %v647_v31, %v647_v31  ;;  %v649_v34 = vpop.eup %648 }
  0xf9   : > { %v346_v35 = vmul.f32 %v649_v34, %v649_v34 }
  0xfa   : > { %355 = vrot.lane.b32.xlu1 %v345_v32, %s658_s23  ;;  %353 = vrot.lane.b32.xlu0 %v344_v33, %s658_s23 }
  0xfe   : > { %357 = vrot.lane.b32.xlu1 %v346_v35, %s658_s23 }
 0x168   : > { %v352_v36 = vpop.permute.xlu0 %351 }
 0x169   : > { %v364_v37 = vsel %vm363_vm1, %v643_v28, %v352_v36 }
 0x16a   : > { %607 = vmatprep.mubr.msk.f32.mxu1 %vm383_vm2, %v364_v37 }
 0x16c   : > { %v356_v38 = vpop.permute.xlu1 %355  ;;  %v354_v39 = vpop.permute.xlu0 %353 }
 0x16d   : > { %v366_v40 = vsel %vm363_vm1, %v647_v31, %v356_v38  ;;  %v365_v41 = vsel %vm363_vm1, %v645_v30, %v354_v39 }
 0x16e   : > { %608 = vmatmul.mubr.msk.f32.vlgmr.msra.gmra.mrb[0].mxu1 %vm383_vm2, %v365_v41 }
 0x16f   : > { %610 = vmatprep.mubr.msk.f32.mxu1 %vm383_vm2, %v366_v40 }
 0x170   : > { %v358_v42 = vpop.permute.xlu1 %357 }
 0x171   : > { %v367_v43 = vsel %vm363_vm1, %v649_v34, %v358_v42 }
 0x172   : > { %611 = vmatmul.mubr.msk.f32.gmra.mrb[2].mxu1 %vm383_vm2, %v367_v43 }
 0x241   : > { %v609_v45 = vpop.f32.mrb[0].mxu1 }
 0x242   : > { %v462_v46 = vpop.f32.mrb[1].mxu1  ;;  %v468_v48 = vadd.f32 %v609_v45, %v556_v44 }
 0x243   : > { %v463_v47 = vadd.f32 %v556_v44, %v462_v46 }
 0x244   : > { %483 = vst.msk [vmem:[%s226_s30 + $0x8] sm:$0xff] %vm481_vm3, %v468_v48 }
 0x245   : > { %482 = vst.msk [vmem:[%s226_s30] sm:$0xff] %vm481_vm3, %v463_v47  ;;  %v612_v49 = vpop.f32.mrb[2].mxu1 }
 0x246   : > { %v472_v50 = vpop.f32.mrb[3].mxu1  ;;  %v478_v52 = vadd.f32 %v612_v49, %v556_v44 }
 0x247   : > { %v473_v51 = vadd.f32 %v556_v44, %v472_v50 }
 0x248   : > { %485 = vst.msk [vmem:[%s226_s30 + $0x18] sm:$0xff] %vm481_vm3, %v478_v52 }
 0x249   : > { %484 = vst.msk [vmem:[%s226_s30 + $0x10] sm:$0xff] %vm481_vm3, %v473_v51 }
 0x24a PF: > { %s15_s18 = sadd.s32 1, %s656_s18  }
 0x24b   : > { %p12_p4 = scmp.ge.s32.totalorder %s15_s18, 4  }
 0x24d   :  { %14 = sbr.rel (!%p12_p4) target bundleno = 1 (0x1), region = 70 }

</bundles_post_ra>
